<compile_context>
chip_gen: v6e
topology: v6e:2x2x1
jax: 0.10.0
libtpu: 0.0.40
codegen_flags: <defaults>
</compile_context>

<pallas_src>
import functools

import jax
import jax.numpy as jnp
import numpy as np
from jax.experimental import pallas as pl
from jax.experimental.pallas import tpu as pltpu


def _gin_kernel(row_ref, col_ref, first_ref, valid_ref,   # scalar prefetch (SMEM)
                eps_ref,        # [1] f32 in SMEM
                a_ref,          # (tm, tk) int8 adjacency block
                feat_res_ref,   # (tm, d_pad) f32 feat tile for the residual
                feat_hbm_ref,   # (n_pad, d_pad) bf16 feat, left in HBM (ANY)
                out_ref,        # (tm, d_pad) f32 output block == accumulator
                feat_vmem,      # (n_pad, d_pad) bf16 resident feat (scratch)
                feat_sem,       # DMA semaphore
                *, tk):
    s = pl.program_id(0)

    # One-time DMA: park the whole bf16 feature matrix in VMEM.  A scratch
    # buffer is single-buffered by construction (vs. the 2x footprint of a
    # pipelined full-array BlockSpec) and persists across grid steps.
    @pl.when(s == 0)
    def _load_feat():
        cp = pltpu.make_async_copy(feat_hbm_ref, feat_vmem, feat_sem)
        cp.start()
        cp.wait()

    # First step of a row tile: initialize the resident f32 output block with
    # the exact-f32 residual term.  The output doubles as the accumulator.
    @pl.when(first_ref[s] == 1)
    def _init():
        out_ref[...] = (1.0 + eps_ref[0]) * feat_res_ref[...]

    # Nonzero adjacency block: accumulate adj_block @ feat[k-block].  The
    # int8 -> bf16 widen runs on VPU slots that are idle while the kernel is
    # adjacency-HBM-bound.
    @pl.when(valid_ref[s] == 1)
    def _accumulate():
        col0 = pl.multiple_of(col_ref[s] * tk, tk)
        fk = feat_vmem[pl.ds(col0, tk), :]
        a = a_ref[...].astype(jnp.bfloat16)
        out_ref[...] += jnp.dot(a, fk, preferred_element_type=jnp.float32)


def build_gin_block_plan(adj, *, tm=256, tk=256):
    """Host-side block-sparsity plan; compute ONCE per graph topology.

    adj: [N, N] dense 0/1 adjacency with adj[i, j] = 1 iff edge j -> i.
    """
    adj_np = np.asarray(adj)
    N = adj_np.shape[0]
    if adj_np.shape != (N, N):
        raise ValueError("adjacency must be square")
    if tm % 8 != 0 or tk % 128 != 0:
        raise ValueError("tm must be a multiple of 8 and tk a multiple of 128")
    # int8 streaming is only lossless for an unweighted 0/1 adjacency.
    if not np.all((adj_np == 0) | (adj_np == 1)):
        raise ValueError("block-sparse GIN kernel assumes an unweighted 0/1 adjacency")

    blk = int(np.lcm(tm, tk))
    n_pad = -(-N // blk) * blk
    adj_p = np.zeros((n_pad, n_pad), np.int8)
    adj_p[:N, :N] = adj_np.astype(np.int8)

    ni, nk = n_pad // tm, n_pad // tk
    blk_mask = adj_p.reshape(ni, tm, nk, tk).any(axis=(1, 3))    # [ni, nk]

    # Flat schedule: one grid step per nonzero adjacency block, with steps of
    # the same row tile contiguous (output block stays resident).  Empty row
    # tiles get a single dummy step that only writes the residual.
    row_ids, col_ids, first, valid = [], [], [], []
    for r in range(ni):
        nz = np.nonzero(blk_mask[r])[0]
        if nz.size == 0:
            row_ids.append(r); col_ids.append(0); first.append(1); valid.append(0)
        else:
            for t, c in enumerate(nz):
                row_ids.append(r)
                col_ids.append(int(c))
                first.append(1 if t == 0 else 0)
                valid.append(1)

    # TODO(synk): on v7x (2 TensorCores), split this flat step list into two
    # nnz-balanced halves on a leading core axis / core_map for megacore use.
    return dict(
        tm=tm, tk=tk, n=N, n_pad=n_pad,
        num_steps=len(row_ids),
        nnz_blocks=int(blk_mask.sum()),
        row_ids=jnp.asarray(row_ids, dtype=jnp.int32),
        col_ids=jnp.asarray(col_ids, dtype=jnp.int32),
        first=jnp.asarray(first, dtype=jnp.int32),
        valid=jnp.asarray(valid, dtype=jnp.int32),
        adj_i8=jnp.asarray(adj_p),      # [n_pad, n_pad] int8, 0/1
    )


def gin_conv(plan, feat, eps):
    """GINConv forward (aggregator='sum', apply_func=None):
         out = (1 + eps) * feat + adj @ feat
    """
    tm, tk, N, n_pad = plan["tm"], plan["tk"], plan["n"], plan["n_pad"]
    num_steps = plan["num_steps"]
    nf, D = feat.shape
    if nf != N:
        raise ValueError("feat rows must match the adjacency used for the plan")
    d_pad = -(-D // 128) * 128

    feat_f32 = jnp.pad(feat.astype(jnp.float32),
                       ((0, n_pad - N), (0, d_pad - D)))
    feat_bf16 = feat_f32.astype(jnp.bfloat16)      # matmul operand, read once
    eps = jnp.asarray(eps, dtype=jnp.float32).reshape(1)

    # Actual VMEM plan (bytes): single-buffered resident bf16 feat + the
    # double-buffered pipelined blocks.
    vmem_plan = (n_pad * d_pad * 2            # resident bf16 feat scratch
                 + 2 * tm * tk * 1            # int8 adjacency blocks
                 + 2 * tm * d_pad * 4         # f32 residual feat tiles
                 + 2 * tm * d_pad * 4)        # f32 output blocks
    # Keep the resident-feat path within a v7x-safe budget.
    # TODO(synk): fall back to a tiled (pipelined) feat BlockSpec for graphs
    # whose padded feature matrix does not fit this budget.
    assert vmem_plan <= 48 * 1024 * 1024, "resident-feat plan exceeds VMEM budget"
    vmem_limit = int(min(max(vmem_plan + (4 << 20), 32 << 20), 64 << 20))

    cost = pl.CostEstimate(
        flops=2 * plan["nnz_blocks"] * tm * tk * d_pad,
        transcendentals=0,
        bytes_accessed=(plan["nnz_blocks"] * tm * tk      # int8 adj stream
                        + n_pad * d_pad * 2               # bf16 feat, once
                        + n_pad * d_pad * 4               # f32 residual feat
                        + n_pad * d_pad * 4),             # f32 output
    )

    kernel = functools.partial(_gin_kernel, tk=tk)

    out = pl.pallas_call(
        kernel,
        out_shape=jax.ShapeDtypeStruct((n_pad, d_pad), jnp.float32),
        grid_spec=pltpu.PrefetchScalarGridSpec(
            num_scalar_prefetch=4,            # row_ids, col_ids, first, valid
            grid=(num_steps,),
            in_specs=[
                # eps scalar in SMEM, untiled.
                pl.BlockSpec(memory_space=pltpu.MemorySpace.SMEM),
                # int8 adjacency: data-dependent (row, col) nonzero block.
                pl.BlockSpec((tm, tk),
                             lambda s, row, col, first, valid: (row[s], col[s])),
                # f32 feat tile for the residual: DMA'd once per row tile.
                pl.BlockSpec((tm, d_pad),
                             lambda s, row, col, first, valid: (row[s], 0)),
                # bf16 feat stays in HBM; copied once into the VMEM scratch.
                pl.BlockSpec(memory_space=pl.ANY),
            ],
            out_specs=pl.BlockSpec((tm, d_pad),
                                   lambda s, row, col, first, valid: (row[s], 0)),
            scratch_shapes=[
                pltpu.VMEM((n_pad, d_pad), jnp.bfloat16),   # resident feat
                pltpu.SemaphoreType.DMA,
            ]),
        compiler_params=pltpu.CompilerParams(
            dimension_semantics=("arbitrary",),
            vmem_limit_bytes=vmem_limit),
        cost_estimate=cost,
    )(plan["row_ids"], plan["col_ids"], plan["first"], plan["valid"],
      eps, plan["adj_i8"], feat_f32, feat_bf16)

    return out[:N, :D]


if __name__ == "__main__":
    # Small synthetic graph: banded + random sparsity so some adjacency blocks
    # are all-zero and the block-skip / dummy-step paths are exercised.
    N, D = 1024, 128
    key = jax.random.PRNGKey(0)
    k_adj, k_feat = jax.random.split(key)

    ii = jnp.arange(N)[:, None]
    jj = jnp.arange(N)[None, :]
    band = jnp.abs(ii - jj) < 96
    rand = jax.random.uniform(k_adj, (N, N)) < 0.05
    adj = (band & rand).astype(jnp.float32)      # edge j -> i
    feat = jax.random.normal(k_feat, (N, D), dtype=jnp.float32)

    # init_eps = 0, learn_eps = False  ->  eps buffer = [0.0]
    eps = jnp.array([0.0], dtype=jnp.float32)

    # TODO(synk): apply_func (external MLP + GraphNorm) and the 'max'/'mean'
    # aggregators are not implemented here; only 'sum' aggregation + residual.
    # TODO(synk): v5e micro-opt: process two nonzero k-blocks per grid step to
    # halve the f32 accumulator read-modify-write store traffic.

    plan = build_gin_block_plan(adj, tm=256, tk=256)   # once per topology
    out = jax.block_until_ready(gin_conv(plan, feat, eps))

    # Reference with the same bf16-matmul / f32-accumulate / f32-residual math.
    ref_bf16 = (1.0 + eps[0]) * feat + jnp.dot(
        adj.astype(jnp.bfloat16), feat.astype(jnp.bfloat16),
        preferred_element_type=jnp.float32)
    np.testing.assert_allclose(np.asarray(out), np.asarray(ref_bf16),
                               rtol=1e-3, atol=1e-3)

    # Loose check against the full-f32 reference (bf16 feat rounding only).
    ref_f32 = (1.0 + eps[0]) * feat + adj @ feat
    np.testing.assert_allclose(np.asarray(out), np.asarray(ref_f32),
                               rtol=5e-2, atol=2e-1)

    print("KERNEL_OK")
</pallas_src>

<mosaic_0001>
module attributes {stable_mosaic.version = 11 : i64} {
  func.func @_gin_kernel(%arg0: i32, %arg1: memref<10xi32, #tpu.memory_space<smem>>, %arg2: memref<10xi32, #tpu.memory_space<smem>>, %arg3: memref<10xi32, #tpu.memory_space<smem>>, %arg4: memref<10xi32, #tpu.memory_space<smem>>, %arg5: memref<1xf32, #tpu.memory_space<smem>>, %arg6: memref<256x256xi8, #tpu.memory_space<vmem>>, %arg7: memref<256x128xf32, #tpu.memory_space<vmem>>, %arg8: memref<1024x128xbf16, #tpu.memory_space<any>>, %arg9: memref<256x128xf32, #tpu.memory_space<vmem>>, %arg10: memref<1024x128xbf16, #tpu.memory_space<vmem>>, %arg11: memref<!tpu.dma_semaphore, #tpu.memory_space<semaphore_mem>>) attributes {dimension_semantics = [#tpu.dimension_semantics<arbitrary>], iteration_bounds = array<i64: 10>, scalar_prefetch = 4 : i64, scratch_operands = 2 : i64, tpu.core_type = #tpu.core_type<tc>, window_params = [{transform_indices = @transform_0, window_bounds = array<i64: 1>}, {transform_indices = @transform_1, window_bounds = array<i64: 256, 256>}, {transform_indices = @transform_2, window_bounds = array<i64: 256, 128>}, {}, {transform_indices = @transform_4, window_bounds = array<i64: 256, 128>}]} {
    %c0_i32 = arith.constant 0 : i32
    %0 = arith.cmpi eq, %arg0, %c0_i32 : i32
    %1 = arith.extui %0 : i1 to i32
    %c0_i32_0 = arith.constant 0 : i32
    %2 = arith.cmpi ne, %1, %c0_i32_0 : i32
    scf.if %2 {
      tpu.enqueue_dma source(%arg8 : memref<1024x128xbf16, #tpu.memory_space<any>>) target(%arg10 : memref<1024x128xbf16, #tpu.memory_space<vmem>>) target_semaphore(%arg11 : memref<!tpu.dma_semaphore, #tpu.memory_space<semaphore_mem>>)
      tpu.wait_dma2 semaphore(%arg11 : memref<!tpu.dma_semaphore, #tpu.memory_space<semaphore_mem>>) src(%arg8 : memref<1024x128xbf16, #tpu.memory_space<any>>) dst(%arg10 : memref<1024x128xbf16, #tpu.memory_space<vmem>>)
    } else {
    }
    %3 = arith.index_cast %arg0 : i32 to index
    %4 = memref.load %arg3[%3] : memref<10xi32, #tpu.memory_space<smem>>
    %c1_i32 = arith.constant 1 : i32
    %5 = arith.cmpi eq, %4, %c1_i32 : i32
    %6 = arith.extui %5 : i1 to i32
    %c0_i32_1 = arith.constant 0 : i32
    %7 = arith.cmpi ne, %6, %c0_i32_1 : i32
    scf.if %7 {
      %c0 = arith.constant 0 : index
      %13 = memref.load %arg5[%c0] : memref<1xf32, #tpu.memory_space<smem>>
      %cst = arith.constant 1.000000e+00 : f32
      %14 = arith.addf %cst, %13 : f32
      %c0_4 = arith.constant 0 : index
      %c0_5 = arith.constant 0 : index
      %15 = vector.load %arg7[%c0_4, %c0_5] : memref<256x128xf32, #tpu.memory_space<vmem>>, vector<256x128xf32>
      %16 = vector.broadcast %14 : f32 to vector<256x128xf32>
      %17 = arith.mulf %16, %15 : vector<256x128xf32>
      %c0_6 = arith.constant 0 : index
      %c0_7 = arith.constant 0 : index
      %18 = vector.load %arg9[%c0_6, %c0_7] : memref<256x128xf32, #tpu.memory_space<vmem>>, vector<256x128xf32>
      tpu.vector_store %arg9[%c0_6, %c0_7], %17 {strides = array<i32>} : memref<256x128xf32, #tpu.memory_space<vmem>>, vector<256x128xf32>,
    } else {
    }
    %8 = arith.index_cast %arg0 : i32 to index
    %9 = memref.load %arg4[%8] : memref<10xi32, #tpu.memory_space<smem>>
    %c1_i32_2 = arith.constant 1 : i32
    %10 = arith.cmpi eq, %9, %c1_i32_2 : i32
    %11 = arith.extui %10 : i1 to i32
    %c0_i32_3 = arith.constant 0 : i32
    %12 = arith.cmpi ne, %11, %c0_i32_3 : i32
    scf.if %12 {
      %13 = arith.index_cast %arg0 : i32 to index
      %14 = memref.load %arg2[%13] : memref<10xi32, #tpu.memory_space<smem>>
      %c256_i32 = arith.constant 256 : i32
      %15 = arith.muli %14, %c256_i32 : i32
      %16 = tpu.assume_multiple %15, 256 : i32
      %17 = arith.index_cast %16 : i32 to index
      %c0 = arith.constant 0 : index
      %18 = vector.load %arg10[%17, %c0] : memref<1024x128xbf16, #tpu.memory_space<vmem>>, vector<256x128xbf16>
      %c0_4 = arith.constant 0 : index
      %c0_5 = arith.constant 0 : index
      %19 = vector.load %arg6[%c0_4, %c0_5] : memref<256x256xi8, #tpu.memory_space<vmem>>, vector<256x256xi8>
      %20 = arith.sitofp %19 : vector<256x256xi8> to vector<256x256xbf16>
      %c0_6 = arith.constant 0 : index
      %c0_7 = arith.constant 0 : index
      %21 = vector.load %arg9[%c0_6, %c0_7] : memref<256x128xf32, #tpu.memory_space<vmem>>, vector<256x128xf32>
      %cst = arith.constant dense<0.000000e+00> : vector<256x128xf32>
      %22 = tpu.matmul %20, %18, %cst {dimension_numbers = #tpu.dot_dimension_numbers<[1], [0], [0], [1], [0, 0, 1, 1], [], []>} : vector<256x256xbf16>, vector<256x128xbf16>, vector<256x128xf32> -> vector<256x128xf32>
      %23 = arith.addf %21, %22 : vector<256x128xf32>
      %c0_8 = arith.constant 0 : index
      %c0_9 = arith.constant 0 : index
      %24 = vector.load %arg9[%c0_8, %c0_9] : memref<256x128xf32, #tpu.memory_space<vmem>>, vector<256x128xf32>
      tpu.vector_store %arg9[%c0_8, %c0_9], %23 {strides = array<i32>} : memref<256x128xf32, #tpu.memory_space<vmem>>, vector<256x128xf32>,
    } else {
    }
    return
  }
  func.func @transform_0(%arg0: i32, %arg1: memref<10xi32, #tpu.memory_space<smem>>, %arg2: memref<10xi32, #tpu.memory_space<smem>>, %arg3: memref<10xi32, #tpu.memory_space<smem>>, %arg4: memref<10xi32, #tpu.memory_space<smem>>) -> i32 {
    %c0_i32 = arith.constant 0 : i32
    %c0_i32_0 = arith.constant 0 : i32
    return %c0_i32 : i32
  }
  func.func @transform_1(%arg0: i32, %arg1: memref<10xi32, #tpu.memory_space<smem>>, %arg2: memref<10xi32, #tpu.memory_space<smem>>, %arg3: memref<10xi32, #tpu.memory_space<smem>>, %arg4: memref<10xi32, #tpu.memory_space<smem>>) -> (i32, i32) {
    %0 = arith.index_cast %arg0 : i32 to index
    %1 = memref.load %arg1[%0] : memref<10xi32, #tpu.memory_space<smem>>
    %2 = arith.index_cast %arg0 : i32 to index
    %3 = memref.load %arg2[%2] : memref<10xi32, #tpu.memory_space<smem>>
    %c0_i32 = arith.constant 0 : i32
    return %1, %3 : i32, i32
  }
  func.func @transform_2(%arg0: i32, %arg1: memref<10xi32, #tpu.memory_space<smem>>, %arg2: memref<10xi32, #tpu.memory_space<smem>>, %arg3: memref<10xi32, #tpu.memory_space<smem>>, %arg4: memref<10xi32, #tpu.memory_space<smem>>) -> (i32, i32) {
    %0 = arith.index_cast %arg0 : i32 to index
    %1 = memref.load %arg1[%0] : memref<10xi32, #tpu.memory_space<smem>>
    %c0_i32 = arith.constant 0 : i32
    %c0_i32_0 = arith.constant 0 : i32
    return %1, %c0_i32 : i32, i32
  }
  func.func @transform_4(%arg0: i32, %arg1: memref<10xi32, #tpu.memory_space<smem>>, %arg2: memref<10xi32, #tpu.memory_space<smem>>, %arg3: memref<10xi32, #tpu.memory_space<smem>>, %arg4: memref<10xi32, #tpu.memory_space<smem>>) -> (i32, i32) {
    %0 = arith.index_cast %arg0 : i32 to index
    %1 = memref.load %arg1[%0] : memref<10xi32, #tpu.memory_space<smem>>
    %c0_i32 = arith.constant 0 : i32
    %c0_i32_0 = arith.constant 0 : i32
    return %1, %c0_i32 : i32, i32
  }
}

</mosaic_0001>

<bundles_post_ra>
// kernel: tpu_custom_call.1
= control target key start
LH: loop header
LB: loop body
LE: loop exit
PB: predicated region body
PF: predicated region fallthrough
CT: control target
= control target key end

     0   :  { %s2157_s0 = inlined_call_operand.vmem [shape: s32[10], index: 0, kind: input, shape index: {}]   ;;  %s2158_s5 = inlined_call_operand.hbm [shape: s8[1024,1024], index: 5, kind: input, shape index: {}]   ;;  %s2159_s6 = inlined_call_operand.hbm [shape: f32[1024,128], index: 6, kind: input, shape index: {}]   ;;  %s2160_s7 = inlined_call_operand.hbm [shape: bf16[1024,128], index: 7, kind: input, shape index: {}]   ;;  %s2161_s8 = inlined_call_operand.hbm [shape: f32[1024,128], index: 8, kind: output, shape index: {}]   ;;  %s2162_s1 = inlined_call_operand.vmem [shape: s32[10], index: 1, kind: input, shape index: {}]   ;;  %s2163_s2 = inlined_call_operand.vmem [shape: s32[10], index: 2, kind: input, shape index: {}]   ;;  %s2164_s3 = inlined_call_operand.vmem [shape: s32[10], index: 3, kind: input, shape index: {}]   ;;  %s2165_s4 = inlined_call_operand.<no memory space> [shape: f32[1], index: 4, kind: input, shape index: {}]  }
   0x1   :  { %2174 = sst [smem:[#allocation35_spill]] %s2158_s5  ;;  %s13_s29 = sshll.u32 %s2157_s0, 4  ;;  %s14_s29 = int_to_ptr.vmem [resolvable:$true] %s13_s29 }
   0x2   :  { %2175 = sst [smem:[#allocation36_spill]] %s2161_s8  ;;  %s17_s10 = sshll.u32 %s2162_s1, 4  ;;  %s18_s10 = int_to_ptr.vmem [resolvable:$true] %s17_s10 }
   0x3   :  { %s1285_s11 = scalar_lea.vmem %s14_s29, 16  ;;  %p1290_p1 = scmp.lt.s32.totalorder %s14_s29, %s14_s29 }
   0x4   :  { %p1286_p0 = scmp.ne.s32.totalorder %s14_s29, %s1285_s11  ;;  %p1291_p2 = scmp.lt.s32.totalorder %s1285_s11, %s1285_s11 }
   0x6   :  { %p1292_p3 = por %p1291_p2, %p1290_p1 }
   0x8   :  { %p1293_p4 = pnand %p1292_p3, %p1286_p0 }
   0xa   :  { %1296 = shalt.err (!%p1293_p4)  }
   0xb   :  { %s1537_s12 = smov [#allocation5]   ;;  %s1297_s13 = scalar_lea.vmem %s18_s10, 16 }
   0xc   :  { %16 = dma.vmem_to_smem %s14_s29, 16, %s1537_s12, [#allocation4] }
   0xd   :  { %p1298_p5 = scmp.ne.s32.totalorder %s18_s10, %s1297_s13  ;;  %p1302_p6 = scmp.lt.s32.totalorder %s18_s10, %s18_s10 }
   0xe   :  { %p1303_p7 = scmp.lt.s32.totalorder %s1297_s13, %s1297_s13 }
  0x10   :  { %p1304_p8 = por %p1303_p7, %p1302_p6 }
  0x12   :  { %p1305_p9 = pnand %p1304_p8, %p1298_p5 }
  0x14   :  { %1308 = shalt.err (!%p1305_p9)  }
  0x15   :  { %s1538_s0 = smov [#allocation6]   ;;  %s21_s15 = sshll.u32 %s2163_s2, 4  ;;  %s22_s15 = int_to_ptr.vmem [resolvable:$true] %s21_s15 }
  0x16   :  { %20 = dma.vmem_to_smem %s18_s10, 16, %s1538_s0, [#allocation4] }
  0x17   :  { %s25_s18 = sshll.u32 %s2164_s3, 4  ;;  %s1309_s19 = scalar_lea.vmem %s22_s15, 16  ;;  %s26_s18 = int_to_ptr.vmem [resolvable:$true] %s25_s18 }
  0x18   :  { %p1310_p10 = scmp.ne.s32.totalorder %s22_s15, %s1309_s19  ;;  %p1314_p11 = scmp.lt.s32.totalorder %s22_s15, %s22_s15 }
  0x19   :  { %p1315_p12 = scmp.lt.s32.totalorder %s1309_s19, %s1309_s19 }
  0x1b   :  { %p1316_p13 = por %p1315_p12, %p1314_p11 }
  0x1d   :  { %p1317_p0 = pnand %p1316_p13, %p1310_p10 }
  0x1f   :  { %1320 = shalt.err (!%p1317_p0)  }
  0x20   :  { %s1539_s20 = smov [#allocation7]   ;;  %s1321_s21 = scalar_lea.vmem %s26_s18, 16 }
  0x21   :  { %24 = dma.vmem_to_smem %s22_s15, 16, %s1539_s20, [#allocation4] }
  0x22   :  { %p1322_p1 = scmp.ne.s32.totalorder %s26_s18, %s1321_s21  ;;  %p1326_p2 = scmp.lt.s32.totalorder %s26_s18, %s26_s18 }
  0x23   :  { %p1327_p3 = scmp.lt.s32.totalorder %s1321_s21, %s1321_s21 }
  0x25   :  { %p1328_p4 = por %p1327_p3, %p1326_p2 }
  0x27   :  { %p1329_p5 = pnand %p1328_p4, %p1322_p1 }
  0x29   :  { %1332 = shalt.err (!%p1329_p5)  }
  0x2a   :  { %s1540_s2 = smov [#allocation8]   ;;  %29 = sst [smem:[#allocation9]] %s2165_s4 }
  0x2b   :  { %28 = dma.vmem_to_smem %s26_s18, 16, %s1540_s2, [#allocation4] }
  0x2c   :  { %1479 = dma.done.wait [#allocation4], 64 }
  0x2d   :  { %1480 = vsyncadd [#allocation4], 4294967232 }
  0x2e   :  { %31 = sfence }
  0x2f   :  { %32 = vsyncpa [#allocation11], 0 }
  0x30   :  { %34 = vsyncpa [#allocation11 + $0x1], 0 }
  0x31   :  { %35 = vsyncpa [#allocation14], 0 }
  0x32   :  { %37 = vsyncpa [#allocation14 + $0x1], 0 }
  0x33   :  { %38 = vsyncpa [#allocation12], 0 }
  0x34   :  { %40 = vsyncpa [#allocation12 + $0x1], 0  ;;  %s1612_s23 = smov 0   ;;  %s1614_s24 = smov 0  }
  0x35   :  { %s1616_s25 = smov 0   ;;  %s1618_s26 = smov 0  }
  0x36   :  { %s1620_s27 = smov 0   ;;  %s1622_s4 = smov 0  }
  0x37   :  { %s1624_s28 = smov 0   ;;  %s1626_s29 = smov 0  }
  0x38   :  { %s1628_s30 = smov 0   ;;  %s1630_s9 = smov 0  }
  0x39 LB: > { %2176 = sst [smem:[#allocation32_spill]] %s1531_s30  ;;  %s1663_s10 = sadd.s32 1, %s1535_s9   ;;  %s1535_s9 = sphi %s1630_s9, %s2215_s9   ;;  %s1531_s30 = sphi %s1628_s30, %s2206_s30   ;;  %s1527_s29 = sphi %s1626_s29, %s2214_s29   ;;  %s1523_s28 = sphi %s1624_s28, %s2213_s28   ;;  %s1519_s4 = sphi %s1622_s4, %s2212_s4   ;;  %s1515_s27 = sphi %s1620_s27, %s2211_s27   ;;  %s1511_s26 = sphi %s1618_s26, %s2210_s26   ;;  %s1507_s25 = sphi %s1616_s25, %s2209_s25   ;;  %s1503_s24 = sphi %s1614_s24, %s2208_s24   ;;  %s1499_s23 = sphi %s1612_s23, %s2207_s23  }
  0x3a   : > { %s71_s11 = sld [smem:[#allocation5 + %s1535_s9]]  ;;  %s80_s13 = sadd.s32 1, %s1531_s30 }
  0x3b   : > { %s72_s12 = sld [smem:[#allocation6 + %s1535_s9]]  ;;  %p87_p6 = scmp.ne.s32.totalorder %s1531_s30, %s1527_s29 }
  0x3c   : > { %s73_s0 = sld [smem:[#allocation5 + %s1663_s10]]  ;;  %p2168_p7 = scmp.eq.s32.totalorder %s1535_s9, 0 }
  0x3d   : > { %s74_s1 = sld [smem:[#allocation6 + %s1663_s10]]  ;;  %p2167_p10 = scmp.lt.s32.totalorder %s1535_s9, 10 }
  0x3e   : > { %s1676_s14 = sld [smem:[#allocation5 + %s1663_s10]]  ;;  %p1680_p9 = por %p2168_p7, %p87_p6 }
  0x3f   : > { %s176_s16 = sand.u32 1, %s1531_s30   ;;  %p978_p13 = scmp.ge.s32.totalorder %s1535_s9, 1 }
  0x40   : > { %s970_s17 = sshll.u32 %s176_s16, 7  ;;  %p1692_p12 = pnand %p2167_p10, %p1680_p9 }
  0x41   : > { %s180_s20 = scalar_lea.vmem [#allocation10], %s970_s17  ;;  %p222_p0 = scmp.lt.s32.totalorder %s1535_s9, 11 }
  0x42   : > { %s75_s18 = ssub.s32 %s71_s11, %s73_s0  ;;  %s192_s21 = sshll.u32 %s180_s20, 4  ;;  %s1686_s21 = int_to_ptr.vmem [resolvable:$true] %s192_s21 }
  0x43   : > { %s76_s19 = ssub.s32 %s72_s12, %s74_s1  ;;  %p1714_p1 = pnand %p978_p13, %p222_p0 }
  0x44   : > { %s77_s2 = sor.u32 %s76_s19, %s75_s18  ;;  %s2181_s5 = sld [smem:[#allocation35_spill]] }
  0x45   : > { %p78_p11 = scmp.eq.s32.totalorder %s77_s2, 0  ;;  %p1335_p3 = pneg %p1692_p12 }
  0x46   : > { %s1140_s22 = scalar_select %p1680_p9, [#allocation5], [#allocation20] }
  0x47   : > { %s1699_s8 = scalar_select %p78_p11, %s1531_s30, %s80_s13  }
  0x48   : > { %s1141_s11 = scalar_select %p1680_p9, %s1535_s9, 0 }
  0x49   : > { %2179 = sst [smem:[#allocation33_spill]] %s1699_s8  ;;  %s2217_s22 = smov (!%p2167_p10, %s1140_s22), [#allocation24] }
  0x4a   : > { %s2219_s11 = smov (!%p2167_p10, %s1141_s11), 0 }
  0x4b   : > { %s1142_s12 = scalar_select %p1680_p9, [#allocation6], [#allocation21] }
  0x4c   : > { %s181_s0 = sld [smem:[%s2217_s22 + %s2219_s11]]  ;;  %s1723_s22 = scalar_lea.sflag [#allocation11], %s176_s16 }
  0x4d   : > { %s2221_s12 = smov (!%p2167_p10, %s1142_s12), [#allocation25] }
  0x4e   : > { %s182_s1 = sld [smem:[%s2221_s12 + %s2219_s11]] }
  0x4f   : > { %s2180_s18 = scalar_select %p1714_p1, 1, 0 }
  0x52   : > { %s1009_s17 = sshll.u32 %s181_s0, 6 }
  0x54   : > { %s972_s13 = sshll.u32 %s182_s1, 1  ;;  %s1338_s1 = scalar_lea.hbm %s2181_s5, 32768 }
  0x55   : > { %s189_s19 = sadd.s32 %s1009_s17, %s972_s13 }
  0x56   : > { %s974_s20 = sshll.u32 %s189_s19, 7 }
  0x57   : > { %s1721_s15 = scalar_lea.hbm %s2181_s5, %s974_s20 }
  0x58   : > { %s1333_s11 = scalar_lea.hbm %s1721_s15, 2048  ;;  %p1339_p6 = scmp.lt.s32.totalorder %s1721_s15, %s2181_s5 }
  0x59   : > { %p1334_p2 = scmp.ne.s32.totalorder %s1721_s15, %s1333_s11  ;;  %p1340_p9 = scmp.lt.s32.totalorder %s1338_s1, %s1333_s11 }
  0x5b   : > { %p1336_p4 = pnand %p1335_p3, %p1334_p2  ;;  %p1341_p11 = por %p1340_p9, %p1339_p6 }
  0x5d   : > { %p1337_p5 = pneg %p1336_p4 }
  0x5f   : > { %p1342_p13 = pnand %p1341_p11, %p1337_p5 }
  0x61   : > { %1345 = shalt.err (!%p1342_p13)
}
  0x62   : > { %s1346_s8 = scalar_lea.vmem %s1686_s21, 2048  ;;  %s1541_s16 = smov [#allocation10]  }
  0x63   : > { %p1347_p0 = scmp.ne.s32.totalorder %s1686_s21, %s1346_s8  ;;  %s1351_s19 = sshll.u32 %s1541_s16, 4  ;;  %s1352_s19 = int_to_ptr.vmem [resolvable:$false] %s1351_s19 }
  0x64   : > { %s1353_s20 = scalar_lea.vmem %s1352_s19, 4096  ;;  %p1354_p4 = scmp.lt.s32.totalorder %s1686_s21, %s1352_s19 }
  0x65   : > { %p1349_p10 = pnand %p1347_p0, %p1335_p3  ;;  %p1355_p7 = scmp.lt.s32.totalorder %s1353_s20, %s1346_s8 }
  0x67   : > { %p1350_p2 = pneg %p1349_p10  ;;  %p1356_p8 = por %p1355_p7, %p1354_p4 }
  0x69   : > { %p1357_p1 = pnand %p1356_p8, %p1350_p2 }
  0x6b   : > { %1360 = shalt.err (!%p1357_p1)
}
  0x6c   : > { %s1542_s2 = smov 1024   ;;  %s1543_s11 = smov 256  }
  0x6d   : > { %s1544_s12 = smov 16   ;;  %s1745_s0 = sadd.s32 4294967295, %s1535_s9  }
  0x6e   : > { %1164 = dma.hbm_to_vmem [thread:$0]  (!%p1692_p12), %s1721_s15, 2048, %s1686_s21, %s1723_s22, %s1542_s2, %s1543_s11, %s1544_s12  }
  0x6f   : > { %s967_s1 = sadd.s32 4294967294, %s1535_s9   ;;  %p2170_p7 = scmp.eq.s32.totalorder %s1745_s0, 0 }
  0x70   : > { %s103_s17 = sld [smem:[#allocation5 + %s1535_s9]]  ;;  %s108_s8 = sadd.s32 1, %s1519_s4 }
  0x71   : > { %s104_s13 = sld [smem:[#allocation5 + %s1663_s10]]  ;;  %p2182_p8 = scmp.ne.s32.totalorder %s1527_s29, %s1523_s28 }
  0x72   : > { %p115_p12 = scmp.ne.s32.totalorder %s1519_s4, %s1515_s27  ;;  %p121_p1 = scmp.ne.s32.totalorder %s1515_s27, %s1511_s26 }
  0x73   : > { %p1757_p10 = por %p2170_p7, %p2182_p8  ;;  %s131_s21 = sld [smem:[#allocation5 + %s1535_s9]] }
  0x74   : > { %p2184_p3 = scmp.eq.s32.totalorder %s1535_s9, 0  ;;  %s136_s15 = sadd.s32 1, %s1507_s25 }
  0x75   : > { %s2183_s16 = scalar_select %p1757_p10, 1, 0 }
  0x76   : > { %p1768_p5 = por %p115_p12, %p2184_p3  ;;  %p1775_p6 = por %p121_p1, %p2170_p7 }
  0x77   : > { %p146_p9 = scmp.ne.s32.totalorder %s1507_s25, %s1503_s24  ;;  %p147_p11 = scmp.eq.s32.totalorder %s1745_s0, 9 }
  0x78   : > { %s2186_s28 = scalar_select %p1775_p6, 1, 0 }
  0x79   : > { %p152_p13 = scmp.ne.s32.totalorder %s1503_s24, %s1499_s23  ;;  %s105_s26 = ssub.s32 %s103_s17, %s104_s13 }
  0x7a   : > { %p153_p0 = scmp.eq.s32.totalorder %s967_s1, 9  ;;  %p106_p2 = scmp.eq.s32.totalorder %s105_s26, 0 }
  0x7b   : > { %p1784_p4 = por %p147_p11, %p146_p9  ;;  %s133_s19 = ssub.s32 %s131_s21, %s1676_s14 }
  0x7c   : > { %p1789_p8 = por %p153_p0, %p152_p13  ;;  %p134_p12 = scmp.eq.s32.totalorder %s133_s19, 0 }
  0x7d   : > { %s2187_s22 = scalar_select %p1784_p4, 1, 0 }
  0x7e   : > { %s2188_s20 = scalar_select %p1789_p8, 1, 0 }
  0x7f   : > { %s1794_s2 = scalar_select %p106_p2, %s1519_s4, %s108_s8  }
  0x80   : > { %s202_s11 = sand.u32 1, %s1519_s4   ;;  %p2190_p1 = scmp.lt.s32.totalorder %s1535_s9, 10 }
  0x81   : > { %2189 = sst [smem:[#allocation34_spill]] %s1794_s2  ;;  %s975_s12 = sshll.u32 %s202_s11, 8 }
  0x82   : > { %s1798_s5 = scalar_select %p134_p12, %s1507_s25, %s136_s15  }
  0x83   : > { %p1804_p3 = pnand %p2190_p1, %p1768_p5  ;;  %p2192_p9 = pmov %p2190_p1 }
  0x84   : > { %s1145_s14 = scalar_select %p1768_p5, [#allocation5], [#allocation22] }
  0x85   : > { %s1146_s17 = scalar_select %p1768_p5, %s1535_s9, 0 }
  0x86   : > { %s2223_s14 = smov (!%p2192_p9, %s1145_s14), [#allocation26]  ;;  %p2193_p11 = pmov %p2190_p1 }
  0x87   : > { %s206_s8 = scalar_lea.vmem [#allocation13], %s975_s12  ;;  %s1824_s3 = scalar_lea.sflag [#allocation14], %s202_s11 }
  0x88   : > { %s2225_s17 = smov (!%p2193_p11, %s1146_s17), 0  ;;  %s214_s21 = sshll.u32 %s206_s8, 4  ;;  %s1817_s21 = int_to_ptr.vmem [resolvable:$true] %s214_s21 }
  0x89   : > { %s207_s13 = sld [smem:[%s2223_s14 + %s2225_s17]]  ;;  %p1363_p13 = pneg %p1804_p3 }
  0x8a   : > { %s1366_s17 = scalar_lea.hbm %s2159_s6, 16384 }
  0x8f   : > { %s1010_s15 = sshll.u32 %s207_s13, 12 }
  0x90   : > { %s1822_s30 = scalar_lea.hbm %s2159_s6, %s1010_s15 }
  0x91   : > { %s1361_s2 = scalar_lea.hbm %s1822_s30, 4096  ;;  %p1367_p12 = scmp.lt.s32.totalorder %s1822_s30, %s2159_s6 }
  0x92   : > { %p1362_p5 = scmp.ne.s32.totalorder %s1822_s30, %s1361_s2  ;;  %p1368_p1 = scmp.lt.s32.totalorder %s1366_s17, %s1361_s2 }
  0x94   : > { %p1364_p0 = pnand %p1363_p13, %p1362_p5  ;;  %p1369_p9 = por %p1368_p1, %p1367_p12 }
  0x96   : > { %p1365_p2 = pneg %p1364_p0 }
  0x98   : > { %p1370_p11 = pnand %p1369_p9, %p1365_p2 }
  0x9a   : > { %1373 = shalt.err (!%p1370_p11)
}
  0x9b   : > { %s1374_s11 = scalar_lea.vmem %s1817_s21, 4096  ;;  %s1545_s15 = smov [#allocation13]  }
  0x9c   : > { %p1375_p7 = scmp.ne.s32.totalorder %s1817_s21, %s1374_s11  ;;  %s1379_s26 = sshll.u32 %s1545_s15, 4  ;;  %s1380_s26 = int_to_ptr.vmem [resolvable:$false] %s1379_s26 }
  0x9d   : > { %s1381_s19 = scalar_lea.vmem %s1380_s26, 8192  ;;  %p1382_p0 = scmp.lt.s32.totalorder %s1817_s21, %s1380_s26 }
  0x9e   : > { %p1377_p8 = pnand %p1375_p7, %p1363_p13  ;;  %p1383_p4 = scmp.lt.s32.totalorder %s1381_s19, %s1374_s11 }
  0xa0   : > { %p1378_p5 = pneg %p1377_p8  ;;  %p1384_p6 = por %p1383_p4, %p1382_p0 }
  0xa2   : > { %p1385_p10 = pnand %p1384_p6, %p1378_p5 }
  0xa4   : > { %1388 = shalt.err (!%p1385_p10)
}
  0xa5   : > { %s1546_s2 = smov 128   ;;  %s1547_s12 = smov 8  }
  0xa6   : > { %1169 = dma.hbm_to_vmem [thread:$0]  (!%p1804_p3), %s1822_s30, 4096, %s1817_s21, %s1824_s3, %s1546_s2, %s1546_s2, %s1547_s12  }
  0xa7   : > { %p2194_p7 = scmp.ne.s32.totalorder %s2180_s18, 0 }
  0xa8   : > { %s228_s14 = sand.u32 (!%p2194_p7), 1, %s1527_s29   ;;  %p2195_p6 = scmp.ne.s32.totalorder (!%p2194_p7), %s2183_s16, 0 }
  0xa9   : > { %226 = sbr.rel (%p2194_p7) target bundleno = 568 (0x238), region = 32  ;;  %s979_s17 = sshll.u32 (!%p2194_p7), %s228_s14, 7 }
  0xaa   : > { %s229_s13 = scalar_lea.sflag (!%p2194_p7), [#allocation11], %s228_s14  ;;  %s1848_s8 = scalar_lea.vmem (!%p2194_p7), [#allocation10], %s979_s17 }
  0xae   : > { %1482 = dma.done.wait (%p2195_p6), %s229_s13, 2048  }
  0xaf   : > { %1484 = vsyncadd (%p2195_p6), %s229_s13, 4294965248  ;;  %s237_s11 = sand.u32 1, %s1515_s27   ;;  %p2196_p10 = scmp.ne.s32.totalorder %s2186_s28, 0 }
  0xb0   : > { %s980_s1 = sshll.u32 %s237_s11, 8  ;;  %s238_s30 = scalar_lea.sflag [#allocation14], %s237_s11 }
  0xb1   : > { %s1855_s21 = scalar_lea.vmem [#allocation13], %s980_s1 }
  0xb2   : > { %1486 = dma.done.wait (%p2196_p10), %s238_s30, 4096  }
  0xb3   : > { %1488 = vsyncadd (%p2196_p10), %s238_s30, 4294963200  ;;  %s266_s18 = sand.u32 1, %s1503_s24   ;;  %s1548_s16 = smov [#allocation2]  }
  0xb4   : > { %s981_s3 = sshll.u32 %s266_s18, 8  ;;  %s289_s15 = sshll.u32 %s1548_s16, 4  ;;  %s290_s15 = int_to_ptr.vmem [resolvable:$true] %s289_s15 }
  0xb5   : > { %s1399_s26 = scalar_lea.vmem %s290_s15, 8192  ;;  %p2197_p8 = scmp.eq.s32.totalorder %s1745_s0, 0 }
  0xb6   : > { %p1400_p4 = scmp.ne.s32.totalorder %s290_s15, %s1399_s26  ;;  %p1406_p2 = scmp.lt.s32.totalorder %s290_s15, %s290_s15 }
  0xb7   : > { %p1407_p12 = scmp.lt.s32.totalorder %s1399_s26, %s1399_s26 }
  0xb8   : > { %p1401_p3 = pnand %p1400_p4, %p2197_p8 }
  0xb9   : > { %p1408_p1 = por %p1407_p12, %p1406_p2 }
  0xba   : > { %p1402_p13 = pneg %p1401_p3 }
  0xbc   : > { %p1409_p9 = pnand %p1408_p1, %p1402_p13 }
  0xbe   : > { %1412 = shalt.err (!%p1409_p9)  }
  0xbf   : > { %p2198_p11 = pmov %p2197_p8  ;;  %s1871_s2 = scalar_lea.vmem [#allocation15], %s981_s3 }
  0xc0   : > { %p2199_p5 = pmov %p2197_p8 }
  0xc1   : > { %1151 = dma.hbm_to_vmem [thread:$0]  (%p2198_p11), %s2160_s7, 8192, %s290_s15, [#allocation3] }
  0xc2   : > { %1490 = dma.done.wait (%p2199_p5), [#allocation3], 8192  ;;  %p2200_p0 = pmov %p2199_p5 }
  0xc3   : > { %s297_s12 = sld [smem:[#allocation7 + %s1745_s0]] }
  0xc4   : > { %1492 = vsyncadd (%p2200_p0), [#allocation3], 4294959104 }
  0xc9   : > { %p983_p7 = scmp.ne.s32.totalorder %s297_s12, 1 }
  0xca   : > { %s302_s14 = sld [smem:[#allocation9]] (!%p983_p7) }
  0xcb   : > { %301 = sbr.rel (%p983_p7) target bundleno = 231 (0xe7), region = 52 }
  0xd0   : > { %v304_v0 = vld [vmem:[%s1855_s21] sm:$0xff]  ;;  %v305_v1 = vld [vmem:[%s1855_s21 + $0x8] sm:$0xff]  ;;  %v306_v2 = vld [vmem:[%s1855_s21 + $0x10] sm:$0xff]  ;;  %s303_s17 = sadd.f32 1.0, %s302_s14 }
  0xd1   : > { %v307_v3 = vld [vmem:[%s1855_s21 + $0x18] sm:$0xff]  ;;  %v308_v4 = vld [vmem:[%s1855_s21 + $0x20] sm:$0xff]  ;;  %v309_v5 = vld [vmem:[%s1855_s21 + $0x28] sm:$0xff] }
  0xd2   : > { %v310_v6 = vld [vmem:[%s1855_s21 + $0x30] sm:$0xff]  ;;  %v311_v7 = vld [vmem:[%s1855_s21 + $0x38] sm:$0xff]  ;;  %v312_v8 = vld [vmem:[%s1855_s21 + $0x40] sm:$0xff]  ;;  %v1892_v14 = vstv %s303_s17 }
  0xd3   : > { %v313_v9 = vld [vmem:[%s1855_s21 + $0x48] sm:$0xff]  ;;  %v314_v10 = vld [vmem:[%s1855_s21 + $0x50] sm:$0xff]  ;;  %v315_v11 = vld [vmem:[%s1855_s21 + $0x58] sm:$0xff]  ;;  %v337_v18 = vmul.f32 %v1892_v14, %v304_v0  ;;  %v338_v19 = vmul.f32 %v1892_v14, %v305_v1  ;;  %v339_v20 = vmul.f32 %v1892_v14, %v306_v2  ;;  %v340_v21 = vmul.f32 %v1892_v14, %v307_v3 }
  0xd4   : > { %v316_v12 = vld [vmem:[%s1855_s21 + $0x60] sm:$0xff]  ;;  %v317_v13 = vld [vmem:[%s1855_s21 + $0x68] sm:$0xff]  ;;  %v318_v15 = vld [vmem:[%s1855_s21 + $0x70] sm:$0xff]  ;;  %v341_v25 = vmul.f32 %v1892_v14, %v308_v4  ;;  %v342_v26 = vmul.f32 %v1892_v14, %v309_v5  ;;  %v343_v27 = vmul.f32 %v1892_v14, %v310_v6  ;;  %v344_v28 = vmul.f32 %v1892_v14, %v311_v7 }
  0xd5   : > { %v319_v16 = vld [vmem:[%s1855_s21 + $0x78] sm:$0xff]  ;;  %v320_v17 = vld [vmem:[%s1855_s21 + $0x80] sm:$0xff]  ;;  %v321_v22 = vld [vmem:[%s1855_s21 + $0x88] sm:$0xff]  ;;  %369 = vst [vmem:[%s1871_s2] sm:$0xff] %v337_v18  ;;  %v345_v32 = vmul.f32 %v1892_v14, %v312_v8  ;;  %v346_v33 = vmul.f32 %v1892_v14, %v313_v9  ;;  %v347_v34 = vmul.f32 %v1892_v14, %v314_v10  ;;  %v348_v35 = vmul.f32 %v1892_v14, %v315_v11 }
  0xd6   : > { %v322_v23 = vld [vmem:[%s1855_s21 + $0x90] sm:$0xff]  ;;  %v323_v24 = vld [vmem:[%s1855_s21 + $0x98] sm:$0xff]  ;;  %v324_v29 = vld [vmem:[%s1855_s21 + $0xa0] sm:$0xff]  ;;  %370 = vst [vmem:[%s1871_s2 + $0x8] sm:$0xff] %v338_v19  ;;  %v349_v39 = vmul.f32 %v1892_v14, %v316_v12  ;;  %v350_v40 = vmul.f32 %v1892_v14, %v317_v13  ;;  %v351_v41 = vmul.f32 %v1892_v14, %v318_v15  ;;  %v352_v42 = vmul.f32 %v1892_v14, %v319_v16 }
  0xd7   : > { %v325_v30 = vld [vmem:[%s1855_s21 + $0xa8] sm:$0xff]  ;;  %v326_v31 = vld [vmem:[%s1855_s21 + $0xb0] sm:$0xff]  ;;  %371 = vst [vmem:[%s1871_s2 + $0x10] sm:$0xff] %v339_v20  ;;  %372 = vst [vmem:[%s1871_s2 + $0x18] sm:$0xff] %v340_v21  ;;  %v353_v46 = vmul.f32 %v1892_v14, %v320_v17  ;;  %v354_v47 = vmul.f32 %v1892_v14, %v321_v22  ;;  %v355_v48 = vmul.f32 %v1892_v14, %v322_v23 }
  0xd8   : > { %v327_v36 = vld [vmem:[%s1855_s21 + $0xb8] sm:$0xff]  ;;  %v328_v37 = vld [vmem:[%s1855_s21 + $0xc0] sm:$0xff]  ;;  %v329_v38 = vld [vmem:[%s1855_s21 + $0xc8] sm:$0xff]  ;;  %373 = vst [vmem:[%s1871_s2 + $0x20] sm:$0xff] %v341_v25  ;;  %v356_v49 = vmul.f32 %v1892_v14, %v323_v24  ;;  %v357_v53 = vmul.f32 %v1892_v14, %v324_v29  ;;  %v358_v54 = vmul.f32 %v1892_v14, %v325_v30  ;;  %v359_v55 = vmul.f32 %v1892_v14, %v326_v31 }
  0xd9   : > { %374 = vst [vmem:[%s1871_s2 + $0x28] sm:$0xff] %v342_v26  ;;  %375 = vst [vmem:[%s1871_s2 + $0x30] sm:$0xff] %v343_v27  ;;  %v330_v43 = vld [vmem:[%s1855_s21 + $0xd0] sm:$0xff]  ;;  %v331_v44 = vld [vmem:[%s1855_s21 + $0xd8] sm:$0xff]  ;;  %v360_v56 = vmul.f32 %v1892_v14, %v327_v36  ;;  %v361_v57 = vmul.f32 %v1892_v14, %v328_v37  ;;  %v362_v58 = vmul.f32 %v1892_v14, %v329_v38 }
  0xda   : > { %376 = vst [vmem:[%s1871_s2 + $0x38] sm:$0xff] %v344_v28  ;;  %v332_v45 = vld [vmem:[%s1855_s21 + $0xe0] sm:$0xff]  ;;  %377 = vst [vmem:[%s1871_s2 + $0x40] sm:$0xff] %v345_v32  ;;  %v333_v50 = vld [vmem:[%s1855_s21 + $0xe8] sm:$0xff]  ;;  %v363_v59 = vmul.f32 %v1892_v14, %v330_v43  ;;  %v364_v60 = vmul.f32 %v1892_v14, %v331_v44 }
  0xdb   : > { %378 = vst [vmem:[%s1871_s2 + $0x48] sm:$0xff] %v346_v33  ;;  %379 = vst [vmem:[%s1871_s2 + $0x50] sm:$0xff] %v347_v34  ;;  %v334_v51 = vld [vmem:[%s1855_s21 + $0xf0] sm:$0xff]  ;;  %v335_v52 = vld [vmem:[%s1855_s21 + $0xf8] sm:$0xff]  ;;  %v365_v61 = vmul.f32 %v1892_v14, %v332_v45  ;;  %v366_v62 = vmul.f32 %v1892_v14, %v333_v50 }
  0xdc   : > { %380 = vst [vmem:[%s1871_s2 + $0x58] sm:$0xff] %v348_v35  ;;  %381 = vst [vmem:[%s1871_s2 + $0x60] sm:$0xff] %v349_v39  ;;  %v367_v63 = vmul.f32 %v1892_v14, %v334_v51  ;;  %v368_v0 = vmul.f32 %v1892_v14, %v335_v52 }
  0xdd   : > { %382 = vst [vmem:[%s1871_s2 + $0x68] sm:$0xff] %v350_v40  ;;  %383 = vst [vmem:[%s1871_s2 + $0x70] sm:$0xff] %v351_v41 }
  0xde   : > { %384 = vst [vmem:[%s1871_s2 + $0x78] sm:$0xff] %v352_v42  ;;  %385 = vst [vmem:[%s1871_s2 + $0x80] sm:$0xff] %v353_v46 }
  0xdf   : > { %386 = vst [vmem:[%s1871_s2 + $0x88] sm:$0xff] %v354_v47  ;;  %387 = vst [vmem:[%s1871_s2 + $0x90] sm:$0xff] %v355_v48 }
  0xe0   : > { %388 = vst [vmem:[%s1871_s2 + $0x98] sm:$0xff] %v356_v49  ;;  %389 = vst [vmem:[%s1871_s2 + $0xa0] sm:$0xff] %v357_v53 }
  0xe1   : > { %390 = vst [vmem:[%s1871_s2 + $0xa8] sm:$0xff] %v358_v54  ;;  %391 = vst [vmem:[%s1871_s2 + $0xb0] sm:$0xff] %v359_v55 }
  0xe2   : > { %392 = vst [vmem:[%s1871_s2 + $0xb8] sm:$0xff] %v360_v56  ;;  %393 = vst [vmem:[%s1871_s2 + $0xc0] sm:$0xff] %v361_v57 }
  0xe3   : > { %394 = vst [vmem:[%s1871_s2 + $0xc8] sm:$0xff] %v362_v58  ;;  %395 = vst [vmem:[%s1871_s2 + $0xd0] sm:$0xff] %v363_v59 }
  0xe4   : > { %396 = vst [vmem:[%s1871_s2 + $0xd8] sm:$0xff] %v364_v60  ;;  %397 = vst [vmem:[%s1871_s2 + $0xe0] sm:$0xff] %v365_v61 }
  0xe5   : > { %398 = vst [vmem:[%s1871_s2 + $0xe8] sm:$0xff] %v366_v62  ;;  %399 = vst [vmem:[%s1871_s2 + $0xf0] sm:$0xff] %v367_v63 }
  0xe6   : > { %400 = vst [vmem:[%s1871_s2 + $0xf8] sm:$0xff] %v368_v0 }
  0xe7 PF: > { %s401_s13 = sld [smem:[#allocation8 + %s1745_s0]] }
  0xed   : > { %p984_p6 = scmp.ne.s32.totalorder %s401_s13, 1 }
  0xee   : > { %s406_s11 = sld [smem:[#allocation6 + %s1745_s0]] (!%p984_p6) }
  0xef   : > { %405 = sbr.rel (%p984_p6) target bundleno = 541 (0x21d), region = 56 }
  0xf4   : > { %v1979_v1 = vld [vmem:[%s1848_s8 + $0x8] sm:$0xff]  ;;  %s985_s1 = sshll.u32 %s406_s11, 8  ;;  %v444_v21 = vld [vmem:[%s1848_s8] sm:$0xff]  ;;  %v447_v27 = vld [vmem:[%s1848_s8 + $0x18] sm:$0xff] }
  0xf5   : > { %v1982_v2 = vld [vmem:[%s1848_s8 + $0x48] sm:$0xff]  ;;  %v461_v3 = vunpack.c.l.s8.bf16 %v1979_v1  ;;  %s408_s30 = sshra.s32 %s985_s1, 3  ;;  %v452_v22 = vld [vmem:[%s1848_s8 + $0x40] sm:$0xff]  ;;  %v460_v23 = vunpack.c.l.s8.bf16 %v444_v21  ;;  %v463_v25 = vunpack.c.h.s8.bf16 %v1979_v1  ;;  %v455_v28 = vld [vmem:[%s1848_s8 + $0x58] sm:$0xff]  ;;  %v462_v29 = vunpack.c.h.s8.bf16 %v444_v21 }
  0xf6   : > { %v477_v4 = vunpack.c.l.s8.bf16 %v1982_v2  ;;  %s986_s21 = sshll.u32 %s408_s30, 2  ;;  %v476_v24 = vunpack.c.l.s8.bf16 %v452_v22  ;;  %v479_v26 = vunpack.c.h.s8.bf16 %v1982_v2  ;;  %v478_v30 = vunpack.c.h.s8.bf16 %v452_v22  ;;  %v446_v33 = vld [vmem:[%s1848_s8 + $0x10] sm:$0xff]  ;;  %v449_v39 = vld [vmem:[%s1848_s8 + $0x28] sm:$0xff]  ;;  %v448_v45 = vld [vmem:[%s1848_s8 + $0x20] sm:$0xff] }
  0xf7   : > { %652 = vmatprep.mubr.bf16.mxu0 %v461_v3  ;;  %s1986_s3 = scalar_lea.vmem [#allocation2], %s986_s21  ;;  %v465_v31 = vunpack.c.l.s8.bf16 %v447_v27  ;;  %v481_v32 = vunpack.c.l.s8.bf16 %v455_v28  ;;  %v454_v34 = vld [vmem:[%s1848_s8 + $0x50] sm:$0xff]  ;;  %v464_v35 = vunpack.c.l.s8.bf16 %v446_v33  ;;  %v467_v37 = vunpack.c.h.s8.bf16 %v447_v27  ;;  %v457_v40 = vld [vmem:[%s1848_s8 + $0x68] sm:$0xff]  ;;  %v456_v46 = vld [vmem:[%s1848_s8 + $0x60] sm:$0xff] }
  0xf8   : > { %716 = vmatprep.mubr.bf16.mxu1 %v477_v4  ;;  %v1269_v5 = vld [vmem:[%s1986_s3 + $0x78] sm:$0xff]   ;;  %v1271_v7 = vld [vmem:[%s1986_s3 + $0x70] sm:$0xff]   ;;  %v1273_v9 = vld [vmem:[%s1986_s3 + $0x68] sm:$0xff]   ;;  %v480_v36 = vunpack.c.l.s8.bf16 %v454_v34  ;;  %v483_v38 = vunpack.c.h.s8.bf16 %v455_v28  ;;  %v466_v41 = vunpack.c.h.s8.bf16 %v446_v33  ;;  %v482_v42 = vunpack.c.h.s8.bf16 %v454_v34 }
  0xf9   : > { %v1270_v6 = vld [vmem:[%s1986_s3 + $0x38] sm:$0xff]   ;;  %1012 = vmatprep.subr.bf16.mxu0 %v1269_v5  ;;  %1124 = vmatprep.subr.bf16.mxu1 %v1269_v5  ;;  %v1272_v8 = vld [vmem:[%s1986_s3 + $0x30] sm:$0xff]   ;;  %v1274_v10 = vld [vmem:[%s1986_s3 + $0x28] sm:$0xff]   ;;  %v469_v43 = vunpack.c.l.s8.bf16 %v449_v39  ;;  %v485_v44 = vunpack.c.l.s8.bf16 %v457_v40  ;;  %v468_v47 = vunpack.c.l.s8.bf16 %v448_v45  ;;  %v484_v48 = vunpack.c.l.s8.bf16 %v456_v46 }
  0xfa   : > { %1013 = vmatpush3.bf16.msra.mxu0 %v1270_v6  ;;  %1132 = vmatpush3.bf16.msra.mxu1 %v1270_v6  ;;  %v1275_v11 = vld [vmem:[%s1986_s3 + $0x60] sm:$0xff]   ;;  %v1277_v13 = vld [vmem:[%s1986_s3 + $0x58] sm:$0xff]   ;;  %v1279_v15 = vld [vmem:[%s1986_s3 + $0x50] sm:$0xff]   ;;  %v471_v49 = vunpack.c.h.s8.bf16 %v449_v39  ;;  %v487_v50 = vunpack.c.h.s8.bf16 %v457_v40  ;;  %v470_v53 = vunpack.c.h.s8.bf16 %v448_v45  ;;  %v486_v54 = vunpack.c.h.s8.bf16 %v456_v46 }
  0xfb   : > { %1014 = vmatprep.subr.bf16.mxu0 %v1271_v7  ;;  %1125 = vmatprep.subr.bf16.mxu1 %v1271_v7  ;;  %v1276_v12 = vld [vmem:[%s1986_s3 + $0x20] sm:$0xff]   ;;  %v1278_v14 = vld [vmem:[%s1986_s3 + $0x18] sm:$0xff]   ;;  %v1280_v16 = vld [vmem:[%s1986_s3 + $0x10] sm:$0xff]  }
  0xfc   : > { %v1281_v17 = vld [vmem:[%s1986_s3 + $0x48] sm:$0xff]   ;;  %v1283_v19 = vld [vmem:[%s1986_s3 + $0x40] sm:$0xff]   ;;  %v451_v51 = vld [vmem:[%s1848_s8 + $0x38] sm:$0xff] }
  0xfd   : > { %v1282_v18 = vld [vmem:[%s1986_s3 + $0x8] sm:$0xff]   ;;  %v1284_v20 = vld [vmem:[%s1986_s3] sm:$0xff]   ;;  %v459_v52 = vld [vmem:[%s1848_s8 + $0x78] sm:$0xff]  ;;  %v473_v55 = vunpack.c.l.s8.bf16 %v451_v51  ;;  %v475_v61 = vunpack.c.h.s8.bf16 %v451_v51 }
  0xfe   : > { %1015 = vmatpush3.bf16.msra.mxu0 %v1272_v8  ;;  %1133 = vmatpush3.bf16.msra.mxu1 %v1272_v8  ;;  %v489_v56 = vunpack.c.l.s8.bf16 %v459_v52  ;;  %v450_v57 = vld [vmem:[%s1848_s8 + $0x30] sm:$0xff]  ;;  %v491_v62 = vunpack.c.h.s8.bf16 %v459_v52  ;;  %v492_v3 = vld [vmem:[%s1871_s2] sm:$0xff]  ;;  %v495_v33 = vld [vmem:[%s1871_s2 + $0x18] sm:$0xff] }
  0xff   : > { %1016 = vmatprep.subr.bf16.mxu0 %v1273_v9  ;;  %1126 = vmatprep.subr.bf16.mxu1 %v1273_v9  ;;  %v458_v58 = vld [vmem:[%s1848_s8 + $0x70] sm:$0xff]  ;;  %v472_v59 = vunpack.c.l.s8.bf16 %v450_v57  ;;  %v474_v63 = vunpack.c.h.s8.bf16 %v450_v57  ;;  %v508_v5 = vld [vmem:[%s1871_s2 + $0x80] sm:$0xff] }
 0x100   : > { %v488_v60 = vunpack.c.l.s8.bf16 %v458_v58  ;;  %v490_v0 = vunpack.c.h.s8.bf16 %v458_v58  ;;  %v512_v45 = vld [vmem:[%s1871_s2 + $0xa0] sm:$0xff] }
 0x102   : > { %1017 = vmatpush3.bf16.msra.mxu0 %v1274_v10  ;;  %1134 = vmatpush3.bf16.msra.mxu1 %v1274_v10 }
 0x103   : > { %1018 = vmatprep.subr.bf16.mxu0 %v1275_v11  ;;  %1127 = vmatprep.subr.bf16.mxu1 %v1275_v11 }
 0x106   : > { %1019 = vmatpush3.bf16.msra.mxu0 %v1276_v12  ;;  %1135 = vmatpush3.bf16.msra.mxu1 %v1276_v12 }
 0x107   : > { %1020 = vmatprep.subr.bf16.mxu0 %v1277_v13  ;;  %1128 = vmatprep.subr.bf16.mxu1 %v1277_v13  ;;  %v493_v13 = vld [vmem:[%s1871_s2 + $0x8] sm:$0xff] }
 0x10a   : > { %1021 = vmatpush3.bf16.msra.mxu0 %v1278_v14  ;;  %1136 = vmatpush3.bf16.msra.mxu1 %v1278_v14 }
 0x10b   : > { %1022 = vmatprep.subr.bf16.mxu0 %v1279_v15  ;;  %1129 = vmatprep.subr.bf16.mxu1 %v1279_v15  ;;  %v509_v15 = vld [vmem:[%s1871_s2 + $0x88] sm:$0xff] }
 0x10e   : > { %1023 = vmatpush3.bf16.msra.mxu0 %v1280_v16  ;;  %1137 = vmatpush3.bf16.msra.mxu1 %v1280_v16 }
 0x10f   : > { %1024 = vmatprep.subr.bf16.mxu0 %v1281_v17  ;;  %1130 = vmatprep.subr.bf16.mxu1 %v1281_v17 }
 0x112   : > { %1025 = vmatpush3.bf16.msra.mxu0 %v1282_v18  ;;  %1138 = vmatpush3.bf16.msra.mxu1 %v1282_v18 }
 0x113   : > { %1026 = vmatprep.subr.bf16.mxu0 %v1283_v19  ;;  %1131 = vmatprep.subr.bf16.mxu1 %v1283_v19 }
 0x116   : > { %1027 = vmatpush3.bf16.msra.mxu0 %v1284_v20  ;;  %1139 = vmatpush3.bf16.msra.mxu1 %v1284_v20 }
 0x119   : > { %653 = vmatmul.mubr.bf16.vlgmr.msra.gmra.mxu0 %v460_v23  ;;  %717 = vmatmul.mubr.bf16.vlgmr.msra.gmra.mxu1 %v476_v24  ;;  %v494_v23 = vld [vmem:[%s1871_s2 + $0x10] sm:$0xff] }
 0x11a   : > { %660 = vmatprep.mubr.bf16.mxu0 %v463_v25  ;;  %724 = vmatprep.mubr.bf16.mxu1 %v479_v26  ;;  %v510_v25 = vld [vmem:[%s1871_s2 + $0x90] sm:$0xff] }
 0x121   : > { %661 = vmatmul.mubr.bf16.gmra.mxu0 %v462_v29  ;;  %725 = vmatmul.mubr.bf16.gmra.mxu1 %v478_v30 }
 0x122   : > { %668 = vmatprep.mubr.bf16.mxu0 %v465_v31  ;;  %732 = vmatprep.mubr.bf16.mxu1 %v481_v32 }
 0x129   : > { %669 = vmatmul.mubr.bf16.gmra.mxu0 %v464_v35  ;;  %733 = vmatmul.mubr.bf16.gmra.mxu1 %v480_v36  ;;  %v511_v35 = vld [vmem:[%s1871_s2 + $0x98] sm:$0xff] }
 0x12a   : > { %676 = vmatprep.mubr.bf16.mxu0 %v467_v37  ;;  %740 = vmatprep.mubr.bf16.mxu1 %v483_v38 }
 0x131   : > { %677 = vmatmul.mubr.bf16.gmra.mxu0 %v466_v41  ;;  %741 = vmatmul.mubr.bf16.gmra.mxu1 %v482_v42 }
 0x132   : > { %684 = vmatprep.mubr.bf16.mxu0 %v469_v43  ;;  %748 = vmatprep.mubr.bf16.mxu1 %v485_v44  ;;  %v496_v43 = vld [vmem:[%s1871_s2 + $0x20] sm:$0xff] }
 0x139   : > { %685 = vmatmul.mubr.bf16.gmra.mxu0 %v468_v47  ;;  %749 = vmatmul.mubr.bf16.gmra.mxu1 %v484_v48 }
 0x13a   : > { %692 = vmatprep.mubr.bf16.mxu0 %v471_v49  ;;  %756 = vmatprep.mubr.bf16.mxu1 %v487_v50 }
 0x141   : > { %693 = vmatmul.mubr.bf16.gmra.mxu0 %v470_v53  ;;  %757 = vmatmul.mubr.bf16.gmra.mxu1 %v486_v54  ;;  %v497_v53 = vld [vmem:[%s1871_s2 + $0x28] sm:$0xff] }
 0x142   : > { %700 = vmatprep.mubr.bf16.mxu0 %v473_v55  ;;  %764 = vmatprep.mubr.bf16.mxu1 %v489_v56  ;;  %v513_v55 = vld [vmem:[%s1871_s2 + $0xa8] sm:$0xff] }
 0x149   : > { %701 = vmatmul.mubr.bf16.gmra.mxu0 %v472_v59  ;;  %765 = vmatmul.mubr.bf16.gmra.mxu1 %v488_v60 }
 0x14a   : > { %708 = vmatprep.mubr.bf16.mxu0 %v475_v61  ;;  %772 = vmatprep.mubr.bf16.mxu1 %v491_v62 }
 0x151   : > { %709 = vmatmul.mubr.bf16.gmra.mxu0 %v474_v63  ;;  %773 = vmatmul.mubr.bf16.gmra.mxu1 %v490_v0  ;;  %v498_v63 = vld [vmem:[%s1871_s2 + $0x30] sm:$0xff] }
 0x1d9   : > { %v1028_v1 = vpop.f32.mrf.mxu0  ;;  %v1076_v2 = vpop.f32.mrf.mxu1 }
 0x1db   : > { %v1029_v4 = vpop.f32.mrf.mxu0  ;;  %v1077_v6 = vpop.f32.mrf.mxu1 }
 0x1dc   : > { %v1030_v7 = vadd.f32 %v1029_v4, %v1028_v1  ;;  %v1078_v8 = vadd.f32 %v1077_v6, %v1076_v2  ;;  %v514_v1 = vld [vmem:[%s1871_s2 + $0xb0] sm:$0xff] }
 0x1dd   : > { %v1031_v9 = vpop.f32.mrf.mxu0  ;;  %v1079_v10 = vpop.f32.mrf.mxu1 }
 0x1de   : > { %v781_v11 = vadd.f32 %v1030_v7, %v492_v3  ;;  %v797_v12 = vadd.f32 %v1078_v8, %v508_v5 }
 0x1df   : > { %v1032_v14 = vpop.f32.mrf.mxu0  ;;  %v1080_v16 = vpop.f32.mrf.mxu1 }
 0x1e0   : > { %813 = vst [vmem:[%s1871_s2] sm:$0xff] %v781_v11  ;;  %829 = vst [vmem:[%s1871_s2 + $0x80] sm:$0xff] %v797_v12  ;;  %v1033_v17 = vadd.f32 %v1032_v14, %v1031_v9  ;;  %v1081_v18 = vadd.f32 %v1080_v16, %v1079_v10  ;;  %v499_v9 = vld [vmem:[%s1871_s2 + $0x38] sm:$0xff] }
 0x1e1   : > { %v1034_v19 = vpop.f32.mrf.mxu0  ;;  %v1082_v20 = vpop.f32.mrf.mxu1  ;;  %v515_v11 = vld [vmem:[%s1871_s2 + $0xb8] sm:$0xff] }
 0x1e2   : > { %v782_v21 = vadd.f32 %v1033_v17, %v493_v13  ;;  %v798_v22 = vadd.f32 %v1081_v18, %v509_v15 }
 0x1e3   : > { %v1035_v24 = vpop.f32.mrf.mxu0  ;;  %v1083_v26 = vpop.f32.mrf.mxu1 }
 0x1e4   : > { %814 = vst [vmem:[%s1871_s2 + $0x8] sm:$0xff] %v782_v21  ;;  %830 = vst [vmem:[%s1871_s2 + $0x88] sm:$0xff] %v798_v22  ;;  %v1036_v27 = vadd.f32 %v1035_v24, %v1034_v19  ;;  %v1084_v28 = vadd.f32 %v1083_v26, %v1082_v20  ;;  %v500_v19 = vld [vmem:[%s1871_s2 + $0x40] sm:$0xff] }
 0x1e5   : > { %v1037_v29 = vpop.f32.mrf.mxu0  ;;  %v1085_v30 = vpop.f32.mrf.mxu1  ;;  %v516_v21 = vld [vmem:[%s1871_s2 + $0xc0] sm:$0xff] }
 0x1e6   : > { %v783_v31 = vadd.f32 %v1036_v27, %v494_v23  ;;  %v799_v32 = vadd.f32 %v1084_v28, %v510_v25 }
 0x1e7   : > { %v1038_v34 = vpop.f32.mrf.mxu0  ;;  %v1086_v36 = vpop.f32.mrf.mxu1 }
 0x1e8   : > { %815 = vst [vmem:[%s1871_s2 + $0x10] sm:$0xff] %v783_v31  ;;  %831 = vst [vmem:[%s1871_s2 + $0x90] sm:$0xff] %v799_v32  ;;  %v1039_v37 = vadd.f32 %v1038_v34, %v1037_v29  ;;  %v1087_v38 = vadd.f32 %v1086_v36, %v1085_v30  ;;  %v501_v29 = vld [vmem:[%s1871_s2 + $0x48] sm:$0xff] }
 0x1e9   : > { %v1040_v39 = vpop.f32.mrf.mxu0  ;;  %v1088_v40 = vpop.f32.mrf.mxu1  ;;  %v517_v31 = vld [vmem:[%s1871_s2 + $0xc8] sm:$0xff] }
 0x1ea   : > { %v784_v41 = vadd.f32 %v1039_v37, %v495_v33  ;;  %v800_v42 = vadd.f32 %v1087_v38, %v511_v35 }
 0x1eb   : > { %v1041_v44 = vpop.f32.mrf.mxu0  ;;  %v1089_v46 = vpop.f32.mrf.mxu1 }
 0x1ec   : > { %816 = vst [vmem:[%s1871_s2 + $0x18] sm:$0xff] %v784_v41  ;;  %832 = vst [vmem:[%s1871_s2 + $0x98] sm:$0xff] %v800_v42  ;;  %v1042_v47 = vadd.f32 %v1041_v44, %v1040_v39  ;;  %v1090_v48 = vadd.f32 %v1089_v46, %v1088_v40  ;;  %v502_v39 = vld [vmem:[%s1871_s2 + $0x50] sm:$0xff] }
 0x1ed   : > { %v1043_v49 = vpop.f32.mrf.mxu0  ;;  %v1091_v50 = vpop.f32.mrf.mxu1  ;;  %v518_v41 = vld [vmem:[%s1871_s2 + $0xd0] sm:$0xff] }
 0x1ee   : > { %v785_v51 = vadd.f32 %v1042_v47, %v496_v43  ;;  %v801_v52 = vadd.f32 %v1090_v48, %v512_v45 }
 0x1ef   : > { %v1044_v54 = vpop.f32.mrf.mxu0  ;;  %v1092_v56 = vpop.f32.mrf.mxu1 }
 0x1f0   : > { %817 = vst [vmem:[%s1871_s2 + $0x20] sm:$0xff] %v785_v51  ;;  %833 = vst [vmem:[%s1871_s2 + $0xa0] sm:$0xff] %v801_v52  ;;  %v1045_v57 = vadd.f32 %v1044_v54, %v1043_v49  ;;  %v1093_v58 = vadd.f32 %v1092_v56, %v1091_v50  ;;  %v503_v49 = vld [vmem:[%s1871_s2 + $0x58] sm:$0xff] }
 0x1f1   : > { %v1046_v59 = vpop.f32.mrf.mxu0  ;;  %v1094_v60 = vpop.f32.mrf.mxu1  ;;  %v519_v51 = vld [vmem:[%s1871_s2 + $0xd8] sm:$0xff] }
 0x1f2   : > { %v786_v61 = vadd.f32 %v1045_v57, %v497_v53  ;;  %v802_v62 = vadd.f32 %v1093_v58, %v513_v55 }
 0x1f3   : > { %v1047_v0 = vpop.f32.mrf.mxu0  ;;  %v1095_v2 = vpop.f32.mrf.mxu1 }
 0x1f4   : > { %818 = vst [vmem:[%s1871_s2 + $0x28] sm:$0xff] %v786_v61  ;;  %834 = vst [vmem:[%s1871_s2 + $0xa8] sm:$0xff] %v802_v62  ;;  %v1048_v3 = vadd.f32 %v1047_v0, %v1046_v59  ;;  %v1096_v4 = vadd.f32 %v1095_v2, %v1094_v60  ;;  %v504_v59 = vld [vmem:[%s1871_s2 + $0x60] sm:$0xff] }
 0x1f5   : > { %v1049_v5 = vpop.f32.mrf.mxu0  ;;  %v1097_v6 = vpop.f32.mrf.mxu1  ;;  %v520_v61 = vld [vmem:[%s1871_s2 + $0xe0] sm:$0xff] }
 0x1f6   : > { %v787_v7 = vadd.f32 %v1048_v3, %v498_v63  ;;  %v803_v8 = vadd.f32 %v1096_v4, %v514_v1 }
 0x1f7   : > { %v1050_v10 = vpop.f32.mrf.mxu0  ;;  %v1098_v12 = vpop.f32.mrf.mxu1 }
 0x1f8   : > { %819 = vst [vmem:[%s1871_s2 + $0x30] sm:$0xff] %v787_v7  ;;  %835 = vst [vmem:[%s1871_s2 + $0xb0] sm:$0xff] %v803_v8  ;;  %v1051_v13 = vadd.f32 %v1050_v10, %v1049_v5  ;;  %v1099_v14 = vadd.f32 %v1098_v12, %v1097_v6  ;;  %v505_v5 = vld [vmem:[%s1871_s2 + $0x68] sm:$0xff] }
 0x1f9   : > { %v1052_v15 = vpop.f32.mrf.mxu0  ;;  %v1100_v16 = vpop.f32.mrf.mxu1  ;;  %v521_v7 = vld [vmem:[%s1871_s2 + $0xe8] sm:$0xff] }
 0x1fa   : > { %v788_v17 = vadd.f32 %v1051_v13, %v499_v9  ;;  %v804_v18 = vadd.f32 %v1099_v14, %v515_v11 }
 0x1fb   : > { %v1053_v20 = vpop.f32.mrf.mxu0  ;;  %v1101_v22 = vpop.f32.mrf.mxu1 }
 0x1fc   : > { %820 = vst [vmem:[%s1871_s2 + $0x38] sm:$0xff] %v788_v17  ;;  %836 = vst [vmem:[%s1871_s2 + $0xb8] sm:$0xff] %v804_v18  ;;  %v1054_v23 = vadd.f32 %v1053_v20, %v1052_v15  ;;  %v1102_v24 = vadd.f32 %v1101_v22, %v1100_v16  ;;  %v506_v15 = vld [vmem:[%s1871_s2 + $0x70] sm:$0xff] }
 0x1fd   : > { %v1055_v25 = vpop.f32.mrf.mxu0  ;;  %v1103_v26 = vpop.f32.mrf.mxu1  ;;  %v522_v17 = vld [vmem:[%s1871_s2 + $0xf0] sm:$0xff] }
 0x1fe   : > { %v789_v27 = vadd.f32 %v1054_v23, %v500_v19  ;;  %v805_v28 = vadd.f32 %v1102_v24, %v516_v21 }
 0x1ff   : > { %v1056_v30 = vpop.f32.mrf.mxu0  ;;  %v1104_v32 = vpop.f32.mrf.mxu1 }
 0x200   : > { %821 = vst [vmem:[%s1871_s2 + $0x40] sm:$0xff] %v789_v27  ;;  %837 = vst [vmem:[%s1871_s2 + $0xc0] sm:$0xff] %v805_v28  ;;  %v1057_v33 = vadd.f32 %v1056_v30, %v1055_v25  ;;  %v1105_v34 = vadd.f32 %v1104_v32, %v1103_v26  ;;  %v507_v25 = vld [vmem:[%s1871_s2 + $0x78] sm:$0xff] }
 0x201   : > { %v1058_v35 = vpop.f32.mrf.mxu0  ;;  %v1106_v36 = vpop.f32.mrf.mxu1  ;;  %v523_v27 = vld [vmem:[%s1871_s2 + $0xf8] sm:$0xff] }
 0x202   : > { %v790_v37 = vadd.f32 %v1057_v33, %v501_v29  ;;  %v806_v38 = vadd.f32 %v1105_v34, %v517_v31 }
 0x203   : > { %v1059_v40 = vpop.f32.mrf.mxu0  ;;  %v1107_v42 = vpop.f32.mrf.mxu1 }
 0x204   : > { %822 = vst [vmem:[%s1871_s2 + $0x48] sm:$0xff] %v790_v37  ;;  %838 = vst [vmem:[%s1871_s2 + $0xc8] sm:$0xff] %v806_v38  ;;  %v1060_v43 = vadd.f32 %v1059_v40, %v1058_v35  ;;  %v1108_v44 = vadd.f32 %v1107_v42, %v1106_v36 }
 0x205   : > { %v1061_v45 = vpop.f32.mrf.mxu0  ;;  %v1109_v46 = vpop.f32.mrf.mxu1 }
 0x206   : > { %v791_v47 = vadd.f32 %v1060_v43, %v502_v39  ;;  %v807_v48 = vadd.f32 %v1108_v44, %v518_v41 }
 0x207   : > { %v1062_v50 = vpop.f32.mrf.mxu0  ;;  %v1110_v52 = vpop.f32.mrf.mxu1 }
 0x208   : > { %823 = vst [vmem:[%s1871_s2 + $0x50] sm:$0xff] %v791_v47  ;;  %839 = vst [vmem:[%s1871_s2 + $0xd0] sm:$0xff] %v807_v48  ;;  %v1063_v53 = vadd.f32 %v1062_v50, %v1061_v45  ;;  %v1111_v54 = vadd.f32 %v1110_v52, %v1109_v46 }
 0x209   : > { %v1064_v55 = vpop.f32.mrf.mxu0  ;;  %v1112_v56 = vpop.f32.mrf.mxu1 }
 0x20a   : > { %v792_v57 = vadd.f32 %v1063_v53, %v503_v49  ;;  %v808_v58 = vadd.f32 %v1111_v54, %v519_v51 }
 0x20b   : > { %v1065_v60 = vpop.f32.mrf.mxu0  ;;  %v1113_v62 = vpop.f32.mrf.mxu1 }
 0x20c   : > { %824 = vst [vmem:[%s1871_s2 + $0x58] sm:$0xff] %v792_v57  ;;  %840 = vst [vmem:[%s1871_s2 + $0xd8] sm:$0xff] %v808_v58  ;;  %v1066_v63 = vadd.f32 %v1065_v60, %v1064_v55  ;;  %v1114_v0 = vadd.f32 %v1113_v62, %v1112_v56 }
 0x20d   : > { %v1067_v1 = vpop.f32.mrf.mxu0  ;;  %v1115_v2 = vpop.f32.mrf.mxu1 }
 0x20e   : > { %v793_v3 = vadd.f32 %v1066_v63, %v504_v59  ;;  %v809_v4 = vadd.f32 %v1114_v0, %v520_v61 }
 0x20f   : > { %v1068_v6 = vpop.f32.mrf.mxu0  ;;  %v1116_v8 = vpop.f32.mrf.mxu1 }
 0x210   : > { %825 = vst [vmem:[%s1871_s2 + $0x60] sm:$0xff] %v793_v3  ;;  %841 = vst [vmem:[%s1871_s2 + $0xe0] sm:$0xff] %v809_v4  ;;  %v1069_v9 = vadd.f32 %v1068_v6, %v1067_v1  ;;  %v1117_v10 = vadd.f32 %v1116_v8, %v1115_v2 }
 0x211   : > { %v1070_v11 = vpop.f32.mrf.mxu0  ;;  %v1118_v12 = vpop.f32.mrf.mxu1 }
 0x212   : > { %v794_v13 = vadd.f32 %v1069_v9, %v505_v5  ;;  %v810_v14 = vadd.f32 %v1117_v10, %v521_v7 }
 0x213   : > { %v1071_v16 = vpop.f32.mrf.mxu0  ;;  %v1119_v18 = vpop.f32.mrf.mxu1 }
 0x214   : > { %826 = vst [vmem:[%s1871_s2 + $0x68] sm:$0xff] %v794_v13  ;;  %842 = vst [vmem:[%s1871_s2 + $0xe8] sm:$0xff] %v810_v14  ;;  %v1072_v19 = vadd.f32 %v1071_v16, %v1070_v11  ;;  %v1120_v20 = vadd.f32 %v1119_v18, %v1118_v12 }
 0x215   : > { %v1073_v21 = vpop.f32.mrf.mxu0  ;;  %v1121_v22 = vpop.f32.mrf.mxu1 }
 0x216   : > { %v795_v23 = vadd.f32 %v1072_v19, %v506_v15  ;;  %v811_v24 = vadd.f32 %v1120_v20, %v522_v17 }
 0x217   : > { %v1074_v26 = vpop.f32.mrf.mxu0  ;;  %v1122_v28 = vpop.f32.mrf.mxu1 }
 0x218   : > { %827 = vst [vmem:[%s1871_s2 + $0x70] sm:$0xff] %v795_v23  ;;  %843 = vst [vmem:[%s1871_s2 + $0xf0] sm:$0xff] %v811_v24  ;;  %v1075_v29 = vadd.f32 %v1074_v26, %v1073_v21  ;;  %v1123_v30 = vadd.f32 %v1122_v28, %v1121_v22 }
 0x21a   : > { %v796_v31 = vadd.f32 %v1075_v29, %v507_v25  ;;  %v812_v32 = vadd.f32 %v1123_v30, %v523_v27 }
 0x21c   : > { %828 = vst [vmem:[%s1871_s2 + $0x78] sm:$0xff] %v796_v31  ;;  %844 = vst [vmem:[%s1871_s2 + $0xf8] sm:$0xff] %v812_v32 }
 0x21d PF: > { %p2201_p10 = scmp.ne.s32.totalorder %s2187_s22, 0  ;;  %s860_s15 = sshll.u32 %s1871_s2, 4  ;;  %s2090_s15 = int_to_ptr.vmem [resolvable:$true] %s860_s15 }
 0x21e   : > { %s2202_s12 = sld [smem:[#allocation36_spill]]  ;;  %s2099_s17 = scalar_lea.sflag [#allocation12], %s266_s18 }
 0x21f   : > { %s1153_s8 = scalar_select %p2201_p10, [#allocation5], [#allocation23] }
 0x220   : > { %s2227_s0 = smov (!%p2201_p10, %s1745_s0), 0  ;;  %s1413_s13 = scalar_lea.vmem %s2090_s15, 4096 }
 0x221   : > { %s853_s16 = sld [smem:[%s1153_s8 + %s2227_s0]]  ;;  %p1414_p4 = scmp.ne.s32.totalorder %s2090_s15, %s1413_s13 }
 0x222   : > { %s1549_s0 = smov [#allocation15]  }
 0x223   : > { %p1415_p8 = pnand %p1414_p4, %p2201_p10  ;;  %s1417_s2 = sshll.u32 %s1549_s0, 4  ;;  %s1418_s2 = int_to_ptr.vmem [resolvable:$false] %s1417_s2 }
 0x224   : > { %s1419_s11 = scalar_lea.vmem %s1418_s2, 8192  ;;  %p1420_p13 = scmp.lt.s32.totalorder %s2090_s15, %s1418_s2 }
 0x225   : > { %p1416_p3 = pneg %p1415_p8  ;;  %p1421_p2 = scmp.lt.s32.totalorder %s1419_s11, %s1413_s13 }
 0x227   : > { %s1011_s26 = sshll.u32 %s853_s16, 12  ;;  %p1422_p12 = por %p1421_p2, %p1420_p13 }
 0x228   : > { %s2095_s14 = scalar_lea.hbm %s2202_s12, %s1011_s26 }
 0x229   : > { %p1423_p1 = pnand %p1422_p12, %p1416_p3 }
 0x22b   : > { %1426 = shalt.err (!%p1423_p1)
}
 0x22c   : > { %s1427_s18 = scalar_lea.hbm %s2095_s14, 4096  ;;  %s1431_s21 = scalar_lea.hbm %s2202_s12, 16384 }
 0x22d   : > { %p1428_p9 = scmp.ne.s32.totalorder %s2095_s14, %s1427_s18  ;;  %p1432_p0 = scmp.lt.s32.totalorder %s2095_s14, %s2202_s12 }
 0x22e   : > { %p1433_p7 = scmp.lt.s32.totalorder %s1431_s21, %s1427_s18 }
 0x22f   : > { %p1429_p11 = pnand %p1428_p9, %p2201_p10 }
 0x230   : > { %p1434_p6 = por %p1433_p7, %p1432_p0 }
 0x231   : > { %p1430_p5 = pneg %p1429_p11 }
 0x233   : > { %p1435_p4 = pnand %p1434_p6, %p1430_p5 }
 0x235   : > { %1438 = shalt.err (!%p1435_p4)
}
 0x236   : > { %s1550_s16 = smov 128   ;;  %s1551_s26 = smov 8  }
 0x237   : > { %1155 = dma.vmem_to_hbm [thread:$0]  (%p2201_p10), %s2090_s15, 4096, %s2095_s14, %s2099_s17, %s1550_s16, %s1550_s16, %s1551_s26  }
 0x238 PF: > { %p1176_p8 = scmp.ge.s32.totalorder %s1535_s9, 2  ;;  %s875_s28 = sand.u32 1, %s1499_s23  }
 0x239   : > { %p2203_p3 = scmp.ne.s32.totalorder %s2188_s20, 0  ;;  %s876_s19 = scalar_lea.sflag [#allocation12], %s875_s28 }
 0x23b   : > { %p1171_p13 = pnand %p1176_p8, %p2203_p3 }
 0x23d   : > { %p1172_p2 = pneg %p1171_p13 }
 0x23f   : > { %1494 = dma.done.wait (%p1172_p2), %s876_s19, 4096  }
 0x240   : > { %1496 = vsyncadd (%p1172_p2), %s876_s19, 4294963200  ;;  %s2204_s22 = sld [smem:[#allocation34_spill]]  ;;  %p43_p10 = scmp.ge.s32.totalorder %s1663_s10, 12  }
 0x241   : > { %s2205_s15 = sld [smem:[#allocation32_spill]]  ;;  %s2207_s23 = smov %s1503_s24 }
 0x242   : > { %s2206_s30 = sld [smem:[#allocation33_spill]]  ;;  %s2208_s24 = smov %s1507_s25 }
 0x243   : > { %s2209_s25 = smov %s1798_s5  ;;  %s2210_s26 = smov %s1515_s27 }
 0x244   : > { %s2211_s27 = smov %s1519_s4  ;;  %s2213_s28 = smov %s1527_s29 }
 0x245   : > { %s2215_s9 = smov %s1663_s10  ;;  %45 = sbr.rel (!%p43_p10) target bundleno = 57 (0x39), region = 107 }
 0x246   : > { %s2212_s4 = smov %s2204_s22 }
 0x247   : > { %s2214_s29 = smov %s2205_s15 }
 0x24a   :  { %881 = vsyncpa [#allocation11], 1 }
 0x24b   :  { %883 = vsyncpa [#allocation11 + $0x1], 1 }
 0x24c   :  { %884 = vsyncpa [#allocation14], 1 }
 0x24d   :  { %886 = vsyncpa [#allocation14 + $0x1], 1 }
 0x24e   :  { %887 = vsyncpa [#allocation12], 1 }
 0x24f   :  { %889 = vsyncpa [#allocation12 + $0x1], 1 }
 0x250   :  { %890 = vsyncmov [#allocation3] }
 0x253   :  { %s891_s5 = vpop.sfrf %890 }
 0x254   :  { %p1008_p12 = scmp.ne.s32.totalorder %s891_s5, 0 }
 0x256   :  { %895 = shalt.err (%p1008_p12)  }

</bundles_post_ra>
